<compile_context>
chip_gen: v7x
topology: tpu7x:2x2x1
jax: 0.10.0
libtpu: 0.0.40
codegen_flags: <defaults>
</compile_context>

<pallas_src>
import jax
import jax.numpy as jnp
from jax import lax
from jax.experimental import pallas as pl
from jax.experimental.pallas import tpu as pltpu

INPUT_SIZE = 784
HIDDEN_SIZE = 100
NUM_CLASSES = 10
HIDDEN_PAD = 128  # hidden dim padded to one full 128-lane vreg


def _round_up(v, m):
    return (v + m - 1) // m * m


def mlp_kernel(x_ref, w1_ref, b1_ref, w2_ref, b2_ref, o_ref):
    # Cast the streamed x tile to bf16 in-kernel (hidden under the DMA).
    x = x_ref[...].astype(jnp.bfloat16)
    # Layer 1: (tb, 784)[bf16] . (128, 784)[bf16]^T -> (tb, 128)[f32]
    h = lax.dot_general(
        x, w1_ref[...],
        dimension_numbers=(((1,), (1,)), ((), ())),
        preferred_element_type=jnp.float32,
    )
    h = jnp.maximum(h + b1_ref[...], 0.0)          # bias + ReLU in f32
    h = h.astype(jnp.bfloat16)                     # bf16 into the second MXU pass
    # Layer 2: (tb, 128)[bf16] . (10, 128)[bf16]^T -> (tb, 10)[f32]
    out = lax.dot_general(
        h, w2_ref[...],
        dimension_numbers=(((1,), (1,)), ((), ())),
        preferred_element_type=jnp.float32,
    )
    o_ref[...] = (out + b2_ref[...]).astype(o_ref.dtype)


def prepare_params(w1, b1, w2, b2):
    """One-time parameter prep (hoisted out of the per-call forward path).

    Pads the hidden dim 100 -> 128 with zeros (zero W1 rows / zero b1 lanes /
    zero W2 columns keep the math identical) and casts weights to bf16.
    PyTorch nn.Linear layout (out_features, in_features) is kept as-is.
    """
    w1_p = jnp.zeros((HIDDEN_PAD, INPUT_SIZE), jnp.bfloat16)
    w1_p = w1_p.at[:HIDDEN_SIZE, :].set(jnp.asarray(w1, jnp.bfloat16))
    b1_p = jnp.zeros((1, HIDDEN_PAD), jnp.float32)
    b1_p = b1_p.at[0, :HIDDEN_SIZE].set(jnp.asarray(b1, jnp.float32))
    w2_p = jnp.zeros((NUM_CLASSES, HIDDEN_PAD), jnp.bfloat16)
    w2_p = w2_p.at[:, :HIDDEN_SIZE].set(jnp.asarray(w2, jnp.bfloat16))
    b2_r = jnp.asarray(b2, jnp.float32).reshape(1, NUM_CLASSES)
    return w1_p, b1_p, w2_p, b2_r


def _pick_tb(B, tb):
    tb = max(8, _round_up(tb, 8))
    # Never larger than the (rounded-up) batch.
    tb = min(tb, _round_up(B, 8))
    # If the batch can be split, cap the tile so the grid has >= 2 steps:
    # v7x has 2 TensorCores sharing HBM and a grid of 1 leaves one idle.
    # (No-op on v5e/v6e and for tiny batches.)
    if B > 8:
        tb = min(tb, _round_up(pl.cdiv(B, 2), 8))
    return max(8, tb)


def neural_net_forward(x, params, *, tb=2048):
    """Forward pass of the MLP.

    x      : (B, 784) float32 or bfloat16 (streamed in its native dtype,
             cast to bf16 inside the kernel).
    params : output of prepare_params(w1, b1, w2, b2).
    """
    w1_p, b1_p, w2_p, b2_r = params
    B = x.shape[0]
    tb = _pick_tb(B, tb)
    grid = (pl.cdiv(B, tb),)

    # Explicit VMEM budget: double-buffered x tile (native dtype) + output
    # tiles + resident weights + hidden-activation headroom, plus 50% slack.
    x_itemsize = jnp.dtype(x.dtype).itemsize
    x_bytes = 2 * tb * INPUT_SIZE * x_itemsize
    out_bytes = 2 * tb * NUM_CLASSES * 4
    h_bytes = tb * HIDDEN_PAD * (4 + 2)
    w_bytes = (HIDDEN_PAD * INPUT_SIZE + NUM_CLASSES * HIDDEN_PAD) * 2 \
        + (HIDDEN_PAD + NUM_CLASSES) * 4
    vmem_limit = int(1.5 * (x_bytes + out_bytes + h_bytes + w_bytes)) + (4 << 20)
    vmem_limit = min(vmem_limit, 96 << 20)

    cost = pl.CostEstimate(
        flops=2 * B * INPUT_SIZE * HIDDEN_PAD + 2 * B * HIDDEN_PAD * NUM_CLASSES,
        transcendentals=0,
        bytes_accessed=B * INPUT_SIZE * x_itemsize
        + B * NUM_CLASSES * 4
        + w_bytes,
    )

    return pl.pallas_call(
        mlp_kernel,
        out_shape=jax.ShapeDtypeStruct((B, NUM_CLASSES), jnp.float32),
        grid_spec=pltpu.PrefetchScalarGridSpec(
            num_scalar_prefetch=0,
            grid=grid,
            in_specs=[
                pl.BlockSpec((tb, INPUT_SIZE), lambda i: (i, 0)),           # x tile (streams)
                pl.BlockSpec((HIDDEN_PAD, INPUT_SIZE), lambda i: (0, 0)),   # W1 (resident)
                pl.BlockSpec((1, HIDDEN_PAD), lambda i: (0, 0)),            # b1
                pl.BlockSpec((NUM_CLASSES, HIDDEN_PAD), lambda i: (0, 0)),  # W2
                pl.BlockSpec((1, NUM_CLASSES), lambda i: (0, 0)),           # b2
            ],
            out_specs=pl.BlockSpec((tb, NUM_CLASSES), lambda i: (i, 0)),
        ),
        compiler_params=pltpu.CompilerParams(
            dimension_semantics=("parallel",),
            vmem_limit_bytes=vmem_limit,
        ),
        cost_estimate=cost,
    )(x, w1_p, b1_p, w2_p, b2_r)


def _reference(x, w1, b1, w2, b2):
    h = jnp.maximum(x @ w1.T + b1, 0.0)
    return h @ w2.T + b2


if __name__ == "__main__":
    key = jax.random.PRNGKey(0)
    kx, kw1, kb1, kw2, kb2 = jax.random.split(key, 5)

    # Small batch, deliberately not a multiple of the chosen tile, so the
    # ragged-last-block path (cdiv grid, no padding) is exercised with a
    # multi-step grid.
    B = 20
    x = jax.random.normal(kx, (B, INPUT_SIZE), dtype=jnp.float32)
    w1 = jax.random.normal(kw1, (HIDDEN_SIZE, INPUT_SIZE), dtype=jnp.float32) * 0.05
    b1 = jax.random.normal(kb1, (HIDDEN_SIZE,), dtype=jnp.float32) * 0.05
    w2 = jax.random.normal(kw2, (NUM_CLASSES, HIDDEN_SIZE), dtype=jnp.float32) * 0.05
    b2 = jax.random.normal(kb2, (NUM_CLASSES,), dtype=jnp.float32) * 0.05

    params = prepare_params(w1, b1, w2, b2)   # one-time, hoisted out of forward
    out = neural_net_forward(x, params)       # tb auto-clamped -> grid of 2 steps
    out = jax.block_until_ready(out)

    ref = _reference(x, w1, b1, w2, b2)
    assert out.shape == (B, NUM_CLASSES)
    # bf16 MXU inputs (f32 accumulation) -> intentionally loosened tolerance.
    assert jnp.allclose(out, ref, atol=5e-2, rtol=5e-2), "mismatch vs reference"

    print("KERNEL_OK")
</pallas_src>

<mosaic_0001>
module attributes {stable_mosaic.version = 11 : i64} {
  func.func @mlp_kernel(%arg0: i32, %arg1: memref<16x784xf32, #tpu.memory_space<vmem>>, %arg2: memref<128x784xbf16, #tpu.memory_space<vmem>>, %arg3: memref<1x128xf32, #tpu.memory_space<vmem>>, %arg4: memref<10x128xbf16, #tpu.memory_space<vmem>>, %arg5: memref<1x10xf32, #tpu.memory_space<vmem>>, %arg6: memref<16x10xf32, #tpu.memory_space<vmem>>) attributes {dimension_semantics = [#tpu.dimension_semantics<parallel>], iteration_bounds = array<i64: 2>, scalar_prefetch = 0 : i64, scratch_operands = 0 : i64, tpu.core_type = #tpu.core_type<tc>, window_params = [{transform_indices = @transform_0, window_bounds = array<i64: 16, 784>}, {pipeline_mode = #tpu.pipeline_mode<synchronous>, transform_indices = @transform_1, window_bounds = array<i64: 128, 784>}, {pipeline_mode = #tpu.pipeline_mode<synchronous>, transform_indices = @transform_2, window_bounds = array<i64: 1, 128>}, {pipeline_mode = #tpu.pipeline_mode<synchronous>, transform_indices = @transform_3, window_bounds = array<i64: 10, 128>}, {pipeline_mode = #tpu.pipeline_mode<synchronous>, transform_indices = @transform_4, window_bounds = array<i64: 1, 10>}, {transform_indices = @transform_5, window_bounds = array<i64: 16, 10>}]} {
    %c0 = arith.constant 0 : index
    %c0_0 = arith.constant 0 : index
    %0 = vector.load %arg1[%c0, %c0_0] : memref<16x784xf32, #tpu.memory_space<vmem>>, vector<16x784xf32>
    %1 = arith.truncf %0 : vector<16x784xf32> to vector<16x784xbf16>
    %c0_1 = arith.constant 0 : index
    %c0_2 = arith.constant 0 : index
    %2 = vector.load %arg2[%c0_1, %c0_2] : memref<128x784xbf16, #tpu.memory_space<vmem>>, vector<128x784xbf16>
    %cst = arith.constant dense<0.000000e+00> : vector<16x128xf32>
    %3 = tpu.matmul %1, %2, %cst {dimension_numbers = #tpu.dot_dimension_numbers<[1], [1], [0], [0], [0, 0, 1, 0], [], []>} : vector<16x784xbf16>, vector<128x784xbf16>, vector<16x128xf32> -> vector<16x128xf32>
    %c0_3 = arith.constant 0 : index
    %c0_4 = arith.constant 0 : index
    %4 = vector.load %arg3[%c0_3, %c0_4] : memref<1x128xf32, #tpu.memory_space<vmem>>, vector<1x128xf32>
    %5 = vector.broadcast %4 : vector<1x128xf32> to vector<16x128xf32>
    %6 = arith.addf %3, %5 : vector<16x128xf32>
    %cst_5 = arith.constant 0.000000e+00 : f32
    %7 = vector.broadcast %cst_5 : f32 to vector<16x128xf32>
    %8 = arith.maximumf %6, %7 : vector<16x128xf32>
    %9 = arith.truncf %8 : vector<16x128xf32> to vector<16x128xbf16>
    %c0_6 = arith.constant 0 : index
    %c0_7 = arith.constant 0 : index
    %10 = vector.load %arg4[%c0_6, %c0_7] : memref<10x128xbf16, #tpu.memory_space<vmem>>, vector<10x128xbf16>
    %cst_8 = arith.constant dense<0.000000e+00> : vector<16x10xf32>
    %11 = tpu.matmul %9, %10, %cst_8 {dimension_numbers = #tpu.dot_dimension_numbers<[1], [1], [0], [0], [0, 0, 1, 0], [], []>} : vector<16x128xbf16>, vector<10x128xbf16>, vector<16x10xf32> -> vector<16x10xf32>
    %c0_9 = arith.constant 0 : index
    %c0_10 = arith.constant 0 : index
    %12 = vector.load %arg5[%c0_9, %c0_10] : memref<1x10xf32, #tpu.memory_space<vmem>>, vector<1x10xf32>
    %13 = vector.broadcast %12 : vector<1x10xf32> to vector<16x10xf32>
    %14 = arith.addf %11, %13 : vector<16x10xf32>
    %c0_11 = arith.constant 0 : index
    %c0_12 = arith.constant 0 : index
    %15 = vector.load %arg6[%c0_11, %c0_12] : memref<16x10xf32, #tpu.memory_space<vmem>>, vector<16x10xf32>
    tpu.vector_store %arg6[%c0_11, %c0_12], %14 {strides = array<i32>} : memref<16x10xf32, #tpu.memory_space<vmem>>, vector<16x10xf32>,
    return
  }
  func.func @transform_0(%arg0: i32) -> (i32, i32) {
    %c0_i32 = arith.constant 0 : i32
    %c0_i32_0 = arith.constant 0 : i32
    return %arg0, %c0_i32 : i32, i32
  }
  func.func @transform_1(%arg0: i32) -> (i32, i32) {
    %c0_i32 = arith.constant 0 : i32
    %c0_i32_0 = arith.constant 0 : i32
    %c0_i32_1 = arith.constant 0 : i32
    return %c0_i32, %c0_i32_0 : i32, i32
  }
  func.func @transform_2(%arg0: i32) -> (i32, i32) {
    %c0_i32 = arith.constant 0 : i32
    %c0_i32_0 = arith.constant 0 : i32
    %c0_i32_1 = arith.constant 0 : i32
    return %c0_i32, %c0_i32_0 : i32, i32
  }
  func.func @transform_3(%arg0: i32) -> (i32, i32) {
    %c0_i32 = arith.constant 0 : i32
    %c0_i32_0 = arith.constant 0 : i32
    %c0_i32_1 = arith.constant 0 : i32
    return %c0_i32, %c0_i32_0 : i32, i32
  }
  func.func @transform_4(%arg0: i32) -> (i32, i32) {
    %c0_i32 = arith.constant 0 : i32
    %c0_i32_0 = arith.constant 0 : i32
    %c0_i32_1 = arith.constant 0 : i32
    return %c0_i32, %c0_i32_0 : i32, i32
  }
  func.func @transform_5(%arg0: i32) -> (i32, i32) {
    %c0_i32 = arith.constant 0 : i32
    %c0_i32_0 = arith.constant 0 : i32
    return %arg0, %c0_i32 : i32, i32
  }
}

</mosaic_0001>

<bundles_post_ra>
// kernel: tpu_custom_call.1
= control target key start
LH: loop header
LB: loop body
LE: loop exit
PB: predicated region body
PF: predicated region fallthrough
CT: control target
= control target key end

     0   :  { %s1528_s18 = smov 0   ;;  %s1530_s19 = smov 0   ;;  %s1826_s0 = inlined_call_operand.vmem [shape: f32[20,784], index: 0, kind: input, shape index: {}]   ;;  %s1827_s1 = inlined_call_operand.vmem [shape: bf16[128,784], index: 1, kind: input, shape index: {}]   ;;  %s1828_s2 = inlined_call_operand.vmem [shape: f32[1,128], index: 2, kind: input, shape index: {}]   ;;  %s1829_s3 = inlined_call_operand.vmem [shape: bf16[10,128], index: 3, kind: input, shape index: {}]   ;;  %s1830_s4 = inlined_call_operand.vmem [shape: f32[1,10], index: 4, kind: input, shape index: {}]   ;;  %s1831_s5 = inlined_call_operand.vmem [shape: f32[20,10], index: 5, kind: output, shape index: {}]  }
   0x1   :  { %s1532_s20 = smov 0  }
   0x2 LB: > { %s1541_s21 = sadd.s32 4294967295, %s1462_s20   ;;  %s1543_s22 = sadd.s32 1, %s1462_s20   ;;  %s1462_s20 = sphi %s1532_s20, %s1835_s20   ;;  %s1458_s19 = sphi %s1530_s19, %s1834_s19   ;;  %s1454_s18 = sphi %s1528_s18, %s1833_s18  }
   0x3   : > { %s129_s23 = ssub.s32 %s1462_s20, %s1543_s22  ;;  %s132_s24 = sadd.s32 1, %s1458_s19 }
   0x4   : > { %p130_p0 = scmp.eq.s32.totalorder %s129_s23, 0  ;;  %p142_p1 = scmp.ne.s32.totalorder %s1458_s19, %s1454_s18 }
   0x5   : > { %p143_p2 = scmp.eq.s32.totalorder %s1541_s21, 1  ;;  %p1103_p3 = scmp.ge.s32.totalorder %s1462_s20, 1 }
   0x6   : > { %s1551_s25 = scalar_select %p130_p0, %s1458_s19, %s132_s24  }
   0x7   : > { %p1553_p4 = por %p143_p2, %p142_p1  ;;  %p199_p5 = scmp.lt.s32.totalorder %s1462_s20, 3 }
   0x9   : > { %p200_p6 = pnand %p1103_p3, %p199_p5 }
   0xa   : > { %v1327_v0 = vld [vmem:[%s1827_s1 + $0x4] ss:$28 sps:$4 sm:$0xff] (!%p200_p6)   ;;  %v1329_v1 = vld [vmem:[%s1827_s1 + $0x14] ss:$28 sps:$4 sm:$0xff] (!%p200_p6)   ;;  %v1333_v4 = vld [vmem:[%s1827_s1 + $0x3c] ss:$28 sps:$4 sm:$0xff] (!%p200_p6)  }
   0xb   : > { %203 = sbr.rel (%p200_p6) target bundleno = 627 (0x273), region = 40  ;;  %655 = vmatprep.subr.bf16.mxu1 (!%p200_p6), %v1327_v0  ;;  %v1331_v2 = vld [vmem:[%s1827_s1] ss:$28 sps:$4 sm:$0xff] (!%p200_p6)   ;;  %v1332_v3 = vld [vmem:[%s1827_s1 + $0x10] ss:$28 sps:$4 sm:$0xff] (!%p200_p6)   ;;  %737 = vmatprep.subr.bf16.mxu0 (!%p200_p6), %v1329_v1  ;;  %s1573_s12 = sshll.u32 (!%p200_p6), %s1541_s21, 1 }
   0xc   : > { %656 = vmatpush1.bf16.xpose.msra.mxu1 (!%p200_p6), %v1331_v2  ;;  %738 = vmatpush1.bf16.xpose.msra.mxu0 (!%p200_p6), %v1332_v3  ;;  %v1335_v5 = vld [vmem:[%s1827_s1 + $0x4c] ss:$28 sps:$4 sm:$0xff] (!%p200_p6)   ;;  %p238_p7 = scmp.lt.s32.totalorder (!%p200_p6), %s1573_s12, 2  ;;  %v1337_v6 = vld [vmem:[%s1827_s1 + $0x38] ss:$28 sps:$4 sm:$0xff] (!%p200_p6)   ;;  %v1496_v43 = vmov (!%p200_p6), 0.0  }
   0xd   : > { %657 = vmatprep.subr.bf16.mxu1 (!%p200_p6), %v1333_v4  ;;  %739 = vmatprep.subr.bf16.mxu0 (!%p200_p6), %v1335_v5  ;;  %v1338_v7 = vld [vmem:[%s1827_s1 + $0x48] ss:$28 sps:$4 sm:$0xff] (!%p200_p6)   ;;  %v1339_v8 = vld [vmem:[%s1827_s1 + $0x74] ss:$28 sps:$4 sm:$0xff] (!%p200_p6)   ;;  %v1344_v11 = vld [vmem:[%s1827_s1 + $0x80] ss:$28 sps:$4 sm:$0xff] (!%p200_p6)  }
   0xe   : > { %v1341_v9 = vld [vmem:[%s1827_s1 + $0x84] ss:$28 sps:$4 sm:$0xff] (!%p200_p6)   ;;  %v1343_v10 = vld [vmem:[%s1827_s1 + $0x70] ss:$28 sps:$4 sm:$0xff] (!%p200_p6)   ;;  %v1347_v13 = vld [vmem:[%s1827_s1 + $0xbc] ss:$28 sps:$4 sm:$0xff] (!%p200_p6)  }
   0xf   : > { %v1345_v12 = vld [vmem:[%s1827_s1 + $0xac] ss:$28 sps:$4 sm:$0xff] (!%p200_p6)   ;;  %v1350_v20 = vld [vmem:[%s1827_s1 + $0xb8] ss:$28 sps:$4 sm:$0xff] (!%p200_p6)   ;;  %v1351_v21 = vld [vmem:[%s1827_s1 + $0xe4] ss:$28 sps:$4 sm:$0xff] (!%p200_p6)  }
  0x10   : > { %v1349_v19 = vld [vmem:[%s1827_s1 + $0xa8] ss:$28 sps:$4 sm:$0xff] (!%p200_p6)   ;;  %v1353_v23 = vld [vmem:[%s1827_s1 + $0xf4] ss:$28 sps:$4 sm:$0xff] (!%p200_p6)   ;;  %v1355_v24 = vld [vmem:[%s1827_s1 + $0xe0] ss:$28 sps:$4 sm:$0xff] (!%p200_p6)  }
  0x11   : > { %v1356_v25 = vld [vmem:[%s1827_s1 + $0xf0] ss:$28 sps:$4 sm:$0xff] (!%p200_p6)   ;;  %v1357_v26 = vld [vmem:[%s1827_s1 + $0x11c] ss:$28 sps:$4 sm:$0xff] (!%p200_p6)   ;;  %v1362_v29 = vld [vmem:[%s1827_s1 + $0x128] ss:$28 sps:$4 sm:$0xff] (!%p200_p6)  }
  0x12   : > { %s239_s29 = scalar_select %p238_p7, %s1573_s12, 2  ;;  %v1359_v27 = vld [vmem:[%s1827_s1 + $0x12c] ss:$28 sps:$4 sm:$0xff]   ;;  %v1361_v28 = vld [vmem:[%s1827_s1 + $0x118] ss:$28 sps:$4 sm:$0xff]   ;;  %vm627_vm0 = vcmask 130048  }
  0x13   : > { %v1363_v30 = vld [vmem:[%s1827_s1 + $0x154] ss:$28 sps:$4 sm:$0xff]   ;;  %v1365_v31 = vld [vmem:[%s1827_s1 + $0x164] ss:$28 sps:$4 sm:$0xff]   ;;  %v1369_v34 = vld [vmem:[%s1827_s1 + $0x18c] ss:$28 sps:$4 sm:$0xff]  }
  0x14   : > { %658 = vmatpush1.bf16.xpose.msra.mxu1 %v1337_v6  ;;  %740 = vmatpush1.bf16.xpose.msra.mxu0 %v1338_v7  ;;  %s1236_s30 = smul.u32 56, %s239_s29  ;;  %v1367_v32 = vld [vmem:[%s1827_s1 + $0x150] ss:$28 sps:$4 sm:$0xff]   ;;  %v1368_v33 = vld [vmem:[%s1827_s1 + $0x160] ss:$28 sps:$4 sm:$0xff]   ;;  %vm1497_vm1 = vmmov 0  }
  0x15   : > { %659 = vmatprep.subr.bf16.mxu1 %v1339_v8  ;;  %741 = vmatprep.subr.bf16.mxu0 %v1341_v9  ;;  %v1371_v35 = vld [vmem:[%s1827_s1 + $0x19c] ss:$28 sps:$4 sm:$0xff]   ;;  %v1373_v36 = vld [vmem:[%s1827_s1 + $0x188] ss:$28 sps:$4 sm:$0xff]   ;;  %v1382_v53 = vld [vmem:[%s1827_s1 + $0x50] ss:$28 sps:$4 sm:$0xff]  }
  0x16   : > { %s1607_s17 = scalar_lea.vmem %s1826_s0, %s1236_s30  ;;  %v1374_v37 = vld [vmem:[%s1827_s1 + $0x198] ss:$28 sps:$4 sm:$0xff]   ;;  %v1377_v38 = vld [vmem:[%s1827_s1 + $0xc] ss:$28 sps:$4 sm:$0xff]   ;;  %v1381_v51 = vld [vmem:[%s1827_s1 + $0x44] ss:$28 sps:$4 sm:$0xff]  }
  0x17   : > { %v256_v14 = vld [vmem:[%s1607_s17 + $0x8] sm:$0xff]  ;;  %v263_v15 = vld [vmem:[%s1607_s17 + $0x40] sm:$0xff]  ;;  %v262_v40 = vld [vmem:[%s1607_s17 + $0x38] sm:$0xff]  ;;  %v635_v55 = vsel %vm627_vm0, %v1382_v53, 0  ;;  %vm878_vm2 = vcmask 80896   ;;  %s1184_s6 = sshll.u32 (%p1553_p4), %s1541_s21, 4 }
  0x18   : > { %v270_v16 = vpack.c.bf16 %v263_v15, %v256_v14  ;;  %v260_v17 = vld [vmem:[%s1607_s17 + $0x28] sm:$0xff]  ;;  %v267_v18 = vld [vmem:[%s1607_s17 + $0x60] sm:$0xff]  ;;  %v266_v42 = vld [vmem:[%s1607_s17 + $0x58] sm:$0xff]  ;;  %s1792_s9 = scalar_lea.vmem (%p1553_p4), %s1831_s5, %s1184_s6  }
  0x19   : > { %v274_v22 = vpack.c.bf16 %v267_v18, %v260_v17  ;;  %v255_v39 = vld [vmem:[%s1607_s17] sm:$0xff]  ;;  %v1378_v44 = vld [vmem:[%s1827_s1 + $0x18] ss:$28 sps:$4 sm:$0xff]   ;;  %v1387_v62 = vld [vmem:[%s1827_s1 + $0xb0] ss:$28 sps:$4 sm:$0xff]  }
  0x1a   : > { %687 = vmatprep.mubr.bf16.mxu1 %v270_v16  ;;  %v259_v41 = vld [vmem:[%s1607_s17 + $0x20] sm:$0xff]  ;;  %v269_v45 = vpack.c.bf16 %v262_v40, %v255_v39  ;;  %v258_v47 = vld [vmem:[%s1607_s17 + $0x18] sm:$0xff]  ;;  %v265_v48 = vld [vmem:[%s1607_s17 + $0x50] sm:$0xff]  ;;  %v632_v50 = vsel %vm627_vm0, %v1378_v44, 0 }
  0x1b   : > { %769 = vmatprep.mubr.bf16.mxu0 %v274_v22  ;;  %v273_v46 = vpack.c.bf16 %v266_v42, %v259_v41  ;;  %v1375_v49 = vld [vmem:[%s1827_s1 + $0x8] ss:$28 sps:$4 sm:$0xff]   ;;  %v272_v52 = vpack.c.bf16 %v265_v48, %v258_v47  ;;  %v1379_v54 = vld [vmem:[%s1827_s1 + $0x40] ss:$28 sps:$4 sm:$0xff]   ;;  %v1383_v58 = vld [vmem:[%s1827_s1 + $0x78] ss:$28 sps:$4 sm:$0xff]  }
  0x1c   : > { %660 = vmatpush1.bf16.xpose.msra.mxu1 %v1343_v10  ;;  %742 = vmatpush1.bf16.xpose.msra.mxu0 %v1344_v11  ;;  %v1385_v56 = vld [vmem:[%s1827_s1 + $0x7c] ss:$28 sps:$4 sm:$0xff]   ;;  %v1386_v57 = vld [vmem:[%s1827_s1 + $0x88] ss:$28 sps:$4 sm:$0xff]   ;;  %v1389_v60 = vld [vmem:[%s1827_s1 + $0xb4] ss:$28 sps:$4 sm:$0xff]  }
  0x1d   : > { %661 = vmatprep.subr.bf16.mxu1 %v1345_v12  ;;  %743 = vmatprep.subr.bf16.mxu0 %v1347_v13  ;;  %v638_v59 = vsel %vm627_vm0, %v1386_v57, 0  ;;  %v1390_v61 = vld [vmem:[%s1827_s1 + $0xc0] ss:$28 sps:$4 sm:$0xff]   ;;  %v1393_v0 = vld [vmem:[%s1827_s1 + $0xec] ss:$28 sps:$4 sm:$0xff]   ;;  %v257_v16 = vld [vmem:[%s1607_s17 + $0x10] sm:$0xff] }
  0x1e   : > { %v641_v63 = vsel %vm627_vm0, %v1390_v61, 0  ;;  %v1394_v1 = vld [vmem:[%s1827_s1 + $0xf8] ss:$28 sps:$4 sm:$0xff]   ;;  %v1391_v2 = vld [vmem:[%s1827_s1 + $0xe8] ss:$28 sps:$4 sm:$0xff]  }
  0x1f   : > { %v644_v3 = vsel %vm627_vm0, %v1394_v1, 0  ;;  %v1397_v4 = vld [vmem:[%s1827_s1 + $0x124] ss:$28 sps:$4 sm:$0xff]   ;;  %v1398_v5 = vld [vmem:[%s1827_s1 + $0x130] ss:$28 sps:$4 sm:$0xff]  }
  0x20   : > { %v1395_v6 = vld [vmem:[%s1827_s1 + $0x120] ss:$28 sps:$4 sm:$0xff]   ;;  %v647_v7 = vsel %vm627_vm0, %v1398_v5, 0  ;;  %v1402_v9 = vld [vmem:[%s1827_s1 + $0x168] ss:$28 sps:$4 sm:$0xff]   ;;  %v261_v18 = vld [vmem:[%s1607_s17 + $0x30] sm:$0xff] }
  0x21   : > { %v1401_v8 = vld [vmem:[%s1827_s1 + $0x15c] ss:$28 sps:$4 sm:$0xff]   ;;  %v650_v11 = vsel %vm627_vm0, %v1402_v9, 0  ;;  %v1405_v12 = vld [vmem:[%s1827_s1 + $0x194] ss:$28 sps:$4 sm:$0xff]   ;;  %v264_v17 = vld [vmem:[%s1607_s17 + $0x48] sm:$0xff] }
  0x22   : > { %v1399_v10 = vld [vmem:[%s1827_s1 + $0x158] ss:$28 sps:$4 sm:$0xff]   ;;  %v1406_v13 = vld [vmem:[%s1827_s1 + $0x1a0] ss:$28 sps:$4 sm:$0xff]   ;;  %v1403_v14 = vld [vmem:[%s1827_s1 + $0x190] ss:$28 sps:$4 sm:$0xff]  }
  0x23   : > { %v653_v15 = vsel %vm627_vm0, %v1406_v13, 0  ;;  %v1407_v22 = vld [vmem:[%s1829_s3] sm:$0x1f]  }
  0x24   : > { %662 = vmatpush1.bf16.xpose.msra.mxu1 %v1349_v19  ;;  %744 = vmatpush1.bf16.xpose.msra.mxu0 %v1350_v20  ;;  %v268_v19 = vld [vmem:[%s1607_s17 + $0x68] sm:$0xff]  ;;  %v271_v20 = vpack.c.bf16 %v264_v17, %v257_v16  ;;  %s229_s17 = sand.u32 1, %s1454_s18   ;;  %v1165_v39 = vld [vmem:[%s1830_s4] ss:$0 sm:$0xff]  ;;  %s889_s18 = ssub.s32 (%p1553_p4), 3, %s1573_s12 }
  0x25   : > { %663 = vmatprep.subr.bf16.mxu1 %v1351_v21  ;;  %745 = vmatprep.subr.bf16.mxu0 %v1353_v23  ;;  %v275_v21 = vpack.c.bf16 %v268_v19, %v261_v18  ;;  %v1107_v23 = vld [vmem:[%s1828_s2] ss:$0 sm:$0xff]  ;;  %s1104_s27 = sshll.u32 %s229_s17, 4  ;;  %p890_p8 = scmp.lt.s32.totalorder (%p1553_p4), %s889_s18, 2 }
  0x26   : > { %s1781_s30 = scalar_lea.vmem [#allocation2], %s1104_s27  }
  0x2c   : > { %664 = vmatpush1.bf16.xpose.msra.mxu1 %v1355_v24  ;;  %746 = vmatpush1.bf16.xpose.msra.mxu0 %v1356_v25 }
  0x2d   : > { %665 = vmatprep.subr.bf16.mxu1 %v1357_v26  ;;  %747 = vmatprep.subr.bf16.mxu0 %v1359_v27 }
  0x34   : > { %666 = vmatpush1.bf16.xpose.msra.mxu1 %v1361_v28  ;;  %748 = vmatpush1.bf16.xpose.msra.mxu0 %v1362_v29 }
  0x35   : > { %667 = vmatprep.subr.bf16.mxu1 %v1363_v30  ;;  %749 = vmatprep.subr.bf16.mxu0 %v1365_v31 }
  0x3c   : > { %668 = vmatpush1.bf16.xpose.msra.mxu1 %v1367_v32  ;;  %750 = vmatpush1.bf16.xpose.msra.mxu0 %v1368_v33 }
  0x3d   : > { %669 = vmatprep.subr.bf16.mxu1 %v1369_v34  ;;  %751 = vmatprep.subr.bf16.mxu0 %v1371_v35 }
  0x44   : > { %670 = vmatpush1.bf16.xpose.msra.mxu1 %v1373_v36  ;;  %752 = vmatpush1.bf16.xpose.msra.mxu0 %v1374_v37 }
  0x45   : > { %696 = vmatprep.subr.bf16.mxu1 %v1377_v38  ;;  %1198 = vmatprep.subr.bf16.mxu0 %v1496_v43 }
  0x4b   : > { %688 = vmatmul.mubr.bf16.vlgmr.msra.gmra.mrb[0].mxu1 %v269_v45  ;;  %770 = vmatmul.mubr.bf16.vlgmr.msra.gmra.mrb[0].mxu0 %v273_v46 }
  0x4c   : > { %697 = vmatpush1.bf16.xpose.msra.mxu1 %v1375_v49  ;;  %1199 = vmatpush3.bf16.xpose.msra.mxu0 %v632_v50 }
  0x4d   : > { %698 = vmatprep.subr.bf16.mxu1 %v1381_v51  ;;  %1200 = vmatprep.subr.bf16.mxu0 %v1496_v43 }
  0x4e   : > { %728 = vmatprep.mubr.bf16.mxu1 %v272_v52  ;;  %1214 = vmatprep.mubr.msk.bf16.mxu0 %vm1497_vm1, %v1496_v43 }
  0x54   : > { %699 = vmatpush1.bf16.xpose.msra.mxu1 %v1379_v54  ;;  %1201 = vmatpush3.bf16.xpose.msra.mxu0 %v635_v55 }
  0x55   : > { %700 = vmatprep.subr.bf16.mxu1 %v1385_v56  ;;  %1202 = vmatprep.subr.bf16.mxu0 %v1496_v43 }
  0x5c   : > { %701 = vmatpush1.bf16.xpose.msra.mxu1 %v1383_v58  ;;  %1203 = vmatpush3.bf16.xpose.msra.mxu0 %v638_v59 }
  0x5d   : > { %702 = vmatprep.subr.bf16.mxu1 %v1389_v60  ;;  %1204 = vmatprep.subr.bf16.mxu0 %v1496_v43 }
  0x64   : > { %703 = vmatpush1.bf16.xpose.msra.mxu1 %v1387_v62  ;;  %1205 = vmatpush3.bf16.xpose.msra.mxu0 %v641_v63 }
  0x65   : > { %704 = vmatprep.subr.bf16.mxu1 %v1393_v0  ;;  %1206 = vmatprep.subr.bf16.mxu0 %v1496_v43 }
  0x6c   : > { %705 = vmatpush1.bf16.xpose.msra.mxu1 %v1391_v2  ;;  %1207 = vmatpush3.bf16.xpose.msra.mxu0 %v644_v3 }
  0x6d   : > { %706 = vmatprep.subr.bf16.mxu1 %v1397_v4  ;;  %1208 = vmatprep.subr.bf16.mxu0 %v1496_v43 }
  0x74   : > { %707 = vmatpush1.bf16.xpose.msra.mxu1 %v1395_v6  ;;  %1209 = vmatpush3.bf16.xpose.msra.mxu0 %v647_v7 }
  0x75   : > { %708 = vmatprep.subr.bf16.mxu1 %v1401_v8  ;;  %1210 = vmatprep.subr.bf16.mxu0 %v1496_v43 }
  0x7c   : > { %709 = vmatpush1.bf16.xpose.msra.mxu1 %v1399_v10  ;;  %1211 = vmatpush3.bf16.xpose.msra.mxu0 %v650_v11 }
  0x7d   : > { %710 = vmatprep.subr.bf16.mxu1 %v1405_v12  ;;  %1212 = vmatprep.subr.bf16.mxu0 %v1496_v43 }
  0x84   : > { %711 = vmatpush1.bf16.xpose.msra.mxu1 %v1403_v14  ;;  %1213 = vmatpush3.bf16.xpose.msra.mxu0 %v653_v15 }
  0x85   : > { %1218 = vmatprep.subr.bf16.mxu1 %v1496_v43 }
  0x8b   : > { %729 = vmatmul.mubr.bf16.vlgmr.msra.gmra.mrb[0].mxu1 %v271_v20  ;;  %1215 = vmatmul.mubr.msk.bf16.vlgmr.msra.gmra.mrb[0].mxu0 %vm627_vm0, %v275_v21 }
  0x8c   : > { %1220 = vmatprep.mubr.msk.bf16.mxu1 %vm1497_vm1, %v1496_v43  ;;  %1219 = vmatpush3.bf16.xpose.msra.mxu1 %v1407_v22 }
 0x15e   : > { %v730_v24 = vpop.f32.mrb[0].mxu1  ;;  %v812_v25 = vpop.f32.mrb[0].mxu0 }
 0x15f   : > { %v1224_v26 = vadd.f32 %v1107_v23, %v730_v24  ;;  %v732_v27 = vpop.f32.mrb[1].mxu1  ;;  %v1216_v28 = vpop.f32.mrb[1].mxu0 }
 0x160   : > { %v733_v29 = vpop.f32.mrb[2].mxu1  ;;  %v815_v30 = vpop.f32.mrb[2].mxu0 }
 0x161   : > { %v1225_v31 = vadd.f32 %v1224_v26, %v812_v25  ;;  %v1226_v32 = vadd.f32 %v1107_v23, %v733_v29  ;;  %v735_v33 = vpop.f32.mrb[3].mxu1  ;;  %v1217_v34 = vpop.f32.mrb[3].mxu0 }
 0x163   : > { %v1227_v35 = vadd.f32 %v1226_v32, %v815_v30  ;;  %v819_v36 = vmax.f32 %v1225_v31, 0.0 }
 0x165   : > { %v820_v37 = vmax.f32 %v1227_v35, 0.0 }
 0x167   : > { %v821_v38 = vpack.c.bf16 %v820_v37, %v819_v36 }
 0x169   : > { %1221 = vmatmul.mubr.bf16.vlgmr.msra.gmra.mrb[4].mxu1 %v821_v38 }
 0x23b   : > { %887 = sbr.rel (!%p1553_p4) target bundleno = 627 (0x273), region = 44 }
 0x23c   : > { %v871_v40 = vpop.f32.mrb[4].mxu1 }
 0x23d   : > { %v872_v41 = vadd.f32 %v1165_v39, %v871_v40  ;;  %v1222_v42 = vpop.f32.mrb[5].mxu1 }
 0x23e   : > { %v874_v43 = vpop.f32.mrb[6].mxu1 }
 0x23f   : > { %879 = vst.msk [vmem:[%s1781_s30] sm:$0xff] %vm878_vm2, %v872_v41  ;;  %v875_v44 = vadd.f32 %v1165_v39, %v874_v43  ;;  %v1223_v45 = vpop.f32.mrb[7].mxu1 }
 0x241   : > { %880 = vst.msk [vmem:[%s1781_s30 + $0x8] sm:$0xff] %vm878_vm2, %v875_v44 }
 0x242   : > { %s1837_s18 = smov (!%p890_p8, %s889_s18), 2 }
 0x243   : > { %s1169_s10 = sshll.u32 %s1837_s18, 7 }
 0x244   : > { %p1172_p9 = scmp.eq.s32.totalorder %s1169_s10, 0 }
 0x245   : > { %s1798_s11 = sshrl.u32 (!%p1172_p9), %s1837_s18, 1 }
 0x246   : > { %898 = sbr.rel (%p1172_p9) target bundleno = 627 (0x273), region = 48  ;;  %p1173_p10 = scmp.le.s32.totalorder (!%p1172_p9), %s1798_s11, 0 }
 0x24d   : > { %1056 = sbr.rel (%p1173_p10) target bundleno = 606 (0x25e), region = 124  ;;  %s1464_s21 = smov (!%p1173_p10), %s1792_s9  }
 0x24e   : > { %s1468_s26 = smov (!%p1173_p10), %s1781_s30   ;;  %s1472_s12 = smov (!%p1173_p10), 0  }
 0x24f   : > { %s1476_s13 = smov (!%p1173_p10), 0  }
 0x254 LB: >> { %v962_v46 = vld [vmem:[%s1470_s26] sm:$0xff]  ;;  %v964_v47 = vld [vmem:[%s1470_s26 + $0x8] sm:$0xff]  ;;  %s966_s14 = sadd.s32 1, %s1474_s12  ;;  %s956_s13 = sadd.s32 1, %s1478_s13   ;;  %s1478_s13 = sphi %s1476_s13, %s956_s13   ;;  %s1474_s12 = sphi %s1472_s12, %s1473_s12   ;;  %s1470_s26 = sphi %s1468_s26, %s971_s26   ;;  %s1466_s21 = sphi %s1464_s21, %s972_s21  }
 0x255   : >> { %963 = vst [vmem:[%s1466_s21] sm:$0xff] %v962_v46  ;;  %965 = vst [vmem:[%s1466_s21 + $0x8] sm:$0xff] %v964_v47  ;;  %p967_p11 = scmp.ge.s32.totalorder %s966_s14, %s1798_s11  ;;  %p955_p12 = scmp.ge.s32.totalorder %s956_s13, %s1798_s11 }
 0x257   : >> { %s1839_s14 = smov (%p967_p11, %s966_s14), 0  ;;  %958 = sbr.rel (!%p955_p12) target bundleno = 596 (0x254), region = 130 }
 0x258   : >> { %s1174_s15 = sshll.u32 %s1839_s14, 4  ;;  %s1473_s12 = smov %s1839_s14  }
 0x259   : >> { %s971_s26 = scalar_lea.vmem %s1781_s30, %s1174_s15 [#allocation2]   ;;  %s972_s21 = scalar_lea.vmem %s1792_s9, %s1174_s15  }
 0x25e PF: > { %s1808_s16 = sand.u32 1, %s1837_s18   ;;  %s1185_s20 = sshll.u32 %s1798_s11, 4 }
 0x25f   : > { %s977_s23 = scalar_lea.vmem %s1781_s30, %s1185_s20 [#allocation2]   ;;  %s979_s24 = scalar_lea.vmem %s1792_s9, %s1185_s20  }
 0x260   : > { %p1179_p13 = scmp.le.s32.totalorder %s1808_s16, 0 }
 0x261   : > { %s1480_s17 = smov (!%p1179_p13), %s979_s24   ;;  %s1484_s27 = smov (!%p1179_p13), %s977_s23  }
 0x262   : > { %1070 = sbr.rel (%p1179_p13) target bundleno = 627 (0x273), region = 135  ;;  %s1488_s28 = smov (!%p1179_p13), 0  }
 0x263   : > { %s1492_s29 = smov (!%p1179_p13), 0  }
 0x269 LB: >> { %v989_v48 = vld [vmem:[%s1486_s27] sm:$0xff]  ;;  %s991_s18 = sadd.s32 1, %s1490_s28  ;;  %s983_s29 = sadd.s32 1, %s1494_s29   ;;  %s1494_s29 = sphi %s1492_s29, %s983_s29   ;;  %s1490_s28 = sphi %s1488_s28, %s1489_s28   ;;  %s1486_s27 = sphi %s1484_s27, %s996_s27   ;;  %s1482_s17 = sphi %s1480_s17, %s997_s17  }
 0x26a   : >> { %990 = vst [vmem:[%s1482_s17] sm:$0xff] %v989_v48  ;;  %p992_p0 = scmp.ge.s32.totalorder %s991_s18, %s1808_s16  ;;  %p982_p1 = scmp.ge.s32.totalorder %s983_s29, %s1808_s16 }
 0x26c   : >> { %s1841_s18 = smov (%p992_p0, %s991_s18), 0  ;;  %985 = sbr.rel (!%p982_p1) target bundleno = 617 (0x269), region = 141 }
 0x26d   : >> { %s1180_s30 = sshll.u32 %s1841_s18, 3  ;;  %s1489_s28 = smov %s1841_s18  }
 0x26e   : >> { %s996_s27 = scalar_lea.vmem %s977_s23, %s1180_s30 [#allocation2]   ;;  %s997_s17 = scalar_lea.vmem %s979_s24, %s1180_s30  }
 0x273 PF: > { %p12_p2 = scmp.ge.s32.totalorder %s1543_s22, 4   ;;  %s1833_s18 = smov %s1458_s19 }
 0x274   : > { %s1834_s19 = smov %s1551_s25  ;;  %s1835_s20 = smov %s1543_s22 }
 0x275   :  { %14 = sbr.rel (!%p12_p2) target bundleno = 2 (0x2), region = 152 }

</bundles_post_ra>
